<compile_context>
chip_gen: v6e
topology: v6e:2x2x1
jax: 0.10.0
libtpu: 0.0.40
codegen_flags: <defaults>
</compile_context>

<pallas_src>
import jax
import jax.numpy as jnp
from jax.experimental import pallas as pl
from jax.experimental.pallas import tpu as pltpu

NORM_EPS = 1e-5


def _round_up(x, m):
    return ((x + m - 1) // m) * m


def _vmem_budget_and_limit():
    """Generation-aware VMEM planning budget and explicit scoped-VMEM limit."""
    try:
        cap = pltpu.get_tpu_info().vmem_capacity_bytes
    except Exception:  # no TPU info available -> conservative (v7x-sized) default
        cap = 64 * 1024 * 1024
    budget = min(int(cap * 0.35), 40 * 1024 * 1024)   # what the tiler plans to use
    limit = min(int(cap * 0.60), 64 * 1024 * 1024)    # scoped limit we request
    return budget, limit


def _pick_tile_hw(hw, n, taps, cin, cout_pad, x_isz, w_isz, o_isz, budget):
    """Largest lane tile (multiple of 128) whose pipelined VMEM footprint fits."""
    def footprint(t):
        return (2 * taps * cin * t * x_isz          # activation block, double-buffered
                + cout_pad * cin * w_isz            # weights, single-buffered
                + 2 * cout_pad * 4                  # scale + bias
                + 2 * cout_pad * t * o_isz          # output block, double-buffered
                + cout_pad * t * 4                  # f32 accumulator temporary
                + cin * t * max(x_isz, w_isz))      # pooled / casted activation temp
    tile = 32768
    while tile > 128 and footprint(tile) > budget:
        tile //= 2
    if n == 1:
        # v7x megacore: keep the (parallel) grid length >= 2 when there is enough work.
        while tile > 128 and tile >= hw:
            tile //= 2
    # hw <= tile -> full-dim block (legal even if hw % 128 != 0); else 128-multiple tile.
    return hw if hw <= tile else tile


def _pe_kernel(x_ref, w_ref, s_ref, b_ref, o_ref):
    # x_ref: (taps, 1, Cin, T)  native dtype     w_ref: (Cout_pad, Cin)  compute dtype
    # s_ref/b_ref: (Cout_pad, 1) f32             o_ref: (1, Cout_pad, T) out dtype
    xs = x_ref[0, 0]
    for t in range(1, x_ref.shape[0]):            # 2x2 pool taps summed on the VPU
        xs = xs + x_ref[t, 0]
    xs = xs.astype(w_ref.dtype)                   # cast for the MXU (free filler)
    acc = jnp.dot(w_ref[...], xs, preferred_element_type=jnp.float32)
    o_ref[0] = (acc * s_ref[...] + b_ref[...]).astype(o_ref.dtype)


def patch_embed(x_nchw, weight=None, gamma=None, beta=None,
                running_mean=None, running_var=None, *,
                stride=1, compute_dtype=jnp.bfloat16, out_dtype=None, tile_hw=None):
    """NextViT PatchEmbed forward.  x_nchw: (N, Cin, H, W), weight: (Cout, Cin, 1, 1).

    Pass weight=None for the identity branch (stride == 1 and cin == cout)."""
    n, cin, h, w = x_nchw.shape

    if weight is None:                 # nn.Identity() branch: nothing to compute
        return x_nchw

    cout = weight.shape[0]
    assert weight.shape == (cout, cin, 1, 1), weight.shape
    out_dtype = x_nchw.dtype if out_dtype is None else out_dtype

    if stride == 2:
        if (h % 2) or (w % 2):
            # TODO(synk): ceil_mode AvgPool2d for odd H/W needs per-window divisors.
            raise NotImplementedError("stride=2 PatchEmbed requires even H and W")
        oh, ow = h // 2, w // 2
        taps = 4
        # Single layout pass: pool taps become a leading axis; channels stay ahead of
        # spatial so the kernel writes NCHW directly (no output transpose).
        lhs = x_nchw.reshape(n, cin, oh, 2, ow, 2).transpose(3, 5, 0, 1, 2, 4)
        lhs = lhs.reshape(taps, n, cin, oh * ow)
        pool_scale = 0.25
    else:
        oh, ow = h, w
        taps = 1
        lhs = x_nchw.reshape(1, n, cin, h * w)     # free view, no transpose
        pool_scale = 1.0

    hw = oh * ow
    cout_pad = _round_up(cout, 8)      # sublane alignment only; lanes carry spatial dim

    w_mat = weight.reshape(cout, cin).astype(compute_dtype)
    if cout_pad != cout:
        w_mat = jnp.pad(w_mat, ((0, cout_pad - cout), (0, 0)))

    # Inference BatchNorm (+ the pool's 1/4) applied to the f32 accumulator post-matmul.
    scale = (gamma.astype(jnp.float32)
             / jnp.sqrt(running_var.astype(jnp.float32) + NORM_EPS))
    bias = beta.astype(jnp.float32) - running_mean.astype(jnp.float32) * scale
    scale_col = jnp.pad(scale * pool_scale, (0, cout_pad - cout)).reshape(cout_pad, 1)
    bias_col = jnp.pad(bias, (0, cout_pad - cout)).reshape(cout_pad, 1)

    budget, vmem_limit = _vmem_budget_and_limit()
    if tile_hw is None:
        tile_hw = _pick_tile_hw(hw, n, taps, cin, cout_pad,
                                jnp.dtype(x_nchw.dtype).itemsize,
                                jnp.dtype(compute_dtype).itemsize,
                                jnp.dtype(out_dtype).itemsize, budget)
    grid = (n, pl.cdiv(hw, tile_hw))   # partial edge block is masked; no activation pad

    cost = pl.CostEstimate(
        flops=2 * n * hw * cin * cout_pad,
        transcendentals=0,
        bytes_accessed=(lhs.size * jnp.dtype(x_nchw.dtype).itemsize
                        + w_mat.size * jnp.dtype(compute_dtype).itemsize
                        + (scale_col.size + bias_col.size) * 4
                        + n * cout_pad * hw * jnp.dtype(out_dtype).itemsize))

    out = pl.pallas_call(
        _pe_kernel,
        out_shape=jax.ShapeDtypeStruct((n, cout_pad, hw), out_dtype),
        grid_spec=pltpu.PrefetchScalarGridSpec(
            num_scalar_prefetch=0,
            grid=grid,
            in_specs=[
                pl.BlockSpec((taps, 1, cin, tile_hw), lambda b, j: (0, b, 0, j)),
                pl.BlockSpec((cout_pad, cin), lambda b, j: (0, 0),
                             pipeline_mode=pl.Buffered(buffer_count=1)),
                pl.BlockSpec((cout_pad, 1), lambda b, j: (0, 0),
                             pipeline_mode=pl.Buffered(buffer_count=1)),
                pl.BlockSpec((cout_pad, 1), lambda b, j: (0, 0),
                             pipeline_mode=pl.Buffered(buffer_count=1)),
            ],
            out_specs=pl.BlockSpec((1, cout_pad, tile_hw), lambda b, j: (b, 0, j)),
        ),
        compiler_params=pltpu.CompilerParams(
            dimension_semantics=("parallel", "parallel"),
            vmem_limit_bytes=vmem_limit),
        cost_estimate=cost,
    )(lhs, w_mat, scale_col, bias_col)

    if cout_pad != cout:
        out = out[:, :cout, :]
    return out.reshape(n, cout, oh, ow)


def _reference(x, weight, gamma, beta, running_mean, running_var, *, stride):
    xf = x.astype(jnp.float32)
    if stride == 2:
        xf = jax.lax.reduce_window(xf, 0.0, jax.lax.add,
                                   (1, 1, 2, 2), (1, 1, 2, 2), "VALID") / 4.0
    y = jax.lax.conv_general_dilated(
        xf, weight.astype(jnp.float32), window_strides=(1, 1), padding="VALID",
        dimension_numbers=("NCHW", "OIHW", "NCHW"))
    scale = gamma / jnp.sqrt(running_var + NORM_EPS)
    bias = beta - running_mean * scale
    return y * scale[None, :, None, None] + bias[None, :, None, None]


if __name__ == "__main__":
    key = jax.random.PRNGKey(0)
    ks = jax.random.split(key, 12)

    def make_params(kset, cin, cout):
        weight = jax.random.normal(kset[0], (cout, cin, 1, 1), jnp.float32) * 0.1
        gamma = jax.random.normal(kset[1], (cout,), jnp.float32) * 0.1 + 1.0
        beta = jax.random.normal(kset[2], (cout,), jnp.float32) * 0.1
        mean = jax.random.normal(kset[3], (cout,), jnp.float32) * 0.1
        var = jax.nn.softplus(jax.random.normal(kset[4], (cout,), jnp.float32)) + 0.5
        return weight, gamma, beta, mean, var

    N, H, W = 2, 16, 16

    # --- branch 1: stride=2  (AvgPool2x2 -> Conv1x1 -> BN) ---
    cin, cout = 4, 8
    x = jax.random.normal(ks[0], (N, cin, H, W), jnp.float32)
    p = make_params(ks[1:6], cin, cout)
    ref = _reference(x, *p, stride=2)
    out = jax.block_until_ready(patch_embed(x, *p, stride=2, compute_dtype=jnp.float32))
    assert out.shape == (N, cout, H // 2, W // 2), out.shape
    assert jnp.allclose(out, ref, atol=1e-4, rtol=1e-4), float(jnp.max(jnp.abs(out - ref)))
    out_bf = jax.block_until_ready(                     # bf16 streaming + bf16 writeback
        patch_embed(x, *p, stride=2, compute_dtype=jnp.bfloat16, out_dtype=jnp.bfloat16))
    assert out_bf.dtype == jnp.bfloat16
    assert jnp.allclose(out_bf.astype(jnp.float32), ref, atol=2e-2, rtol=2e-2), \
        float(jnp.max(jnp.abs(out_bf.astype(jnp.float32) - ref)))

    # --- branch 2: stride=1, cin != cout  (Conv1x1 -> BN) ---
    cin, cout = 4, 8
    x = jax.random.normal(ks[6], (N, cin, H, W), jnp.float32)
    p = make_params(ks[7:12], cin, cout)
    ref = _reference(x, *p, stride=1)
    out = jax.block_until_ready(patch_embed(x, *p, stride=1, compute_dtype=jnp.float32))
    assert out.shape == (N, cout, H, W), out.shape
    assert jnp.allclose(out, ref, atol=1e-4, rtol=1e-4), float(jnp.max(jnp.abs(out - ref)))
    out_bf = jax.block_until_ready(
        patch_embed(x, *p, stride=1, compute_dtype=jnp.bfloat16, out_dtype=jnp.bfloat16))
    assert jnp.allclose(out_bf.astype(jnp.float32), ref, atol=2e-2, rtol=2e-2), \
        float(jnp.max(jnp.abs(out_bf.astype(jnp.float32) - ref)))

    # --- branch 3: stride=1, cin == cout  (identity) ---
    x = jax.random.normal(ks[6], (N, 8, H, W), jnp.float32)
    out = jax.block_until_ready(patch_embed(x, stride=1))
    assert jnp.array_equal(out, x)

    print("KERNEL_OK")
</pallas_src>

<mosaic_0001>
module attributes {stable_mosaic.version = 11 : i64} {
  func.func @_pe_kernel(%arg0: i32, %arg1: i32, %arg2: memref<4x1x4x64xf32, #tpu.memory_space<vmem>>, %arg3: memref<8x4xf32, #tpu.memory_space<vmem>>, %arg4: memref<8x1xf32, #tpu.memory_space<vmem>>, %arg5: memref<8x1xf32, #tpu.memory_space<vmem>>, %arg6: memref<1x8x64xf32, #tpu.memory_space<vmem>>) attributes {dimension_semantics = [#tpu.dimension_semantics<parallel>, #tpu.dimension_semantics<parallel>], iteration_bounds = array<i64: 2, 1>, scalar_prefetch = 0 : i64, scratch_operands = 0 : i64, tpu.core_type = #tpu.core_type<tc>, window_params = [{transform_indices = @transform_0, window_bounds = array<i64: 4, 1, 4, 64>}, {pipeline_mode = #tpu.pipeline_mode<synchronous>, transform_indices = @transform_1, window_bounds = array<i64: 8, 4>}, {pipeline_mode = #tpu.pipeline_mode<synchronous>, transform_indices = @transform_2, window_bounds = array<i64: 8, 1>}, {pipeline_mode = #tpu.pipeline_mode<synchronous>, transform_indices = @transform_3, window_bounds = array<i64: 8, 1>}, {transform_indices = @transform_4, window_bounds = array<i64: 1, 8, 64>}]} {
    %c0 = arith.constant 0 : index
    %c0_0 = arith.constant 0 : index
    %c0_1 = arith.constant 0 : index
    %c0_2 = arith.constant 0 : index
    %0 = vector.load %arg2[%c0, %c0_0, %c0_1, %c0_2] : memref<4x1x4x64xf32, #tpu.memory_space<vmem>>, vector<1x1x4x64xf32>
    %1 = vector.shape_cast %0 : vector<1x1x4x64xf32> to vector<4x64xf32>
    %c1 = arith.constant 1 : index
    %c0_3 = arith.constant 0 : index
    %c0_4 = arith.constant 0 : index
    %c0_5 = arith.constant 0 : index
    %2 = vector.load %arg2[%c1, %c0_3, %c0_4, %c0_5] : memref<4x1x4x64xf32, #tpu.memory_space<vmem>>, vector<1x1x4x64xf32>
    %3 = vector.shape_cast %2 : vector<1x1x4x64xf32> to vector<4x64xf32>
    %4 = arith.addf %1, %3 : vector<4x64xf32>
    %c2 = arith.constant 2 : index
    %c0_6 = arith.constant 0 : index
    %c0_7 = arith.constant 0 : index
    %c0_8 = arith.constant 0 : index
    %5 = vector.load %arg2[%c2, %c0_6, %c0_7, %c0_8] : memref<4x1x4x64xf32, #tpu.memory_space<vmem>>, vector<1x1x4x64xf32>
    %6 = vector.shape_cast %5 : vector<1x1x4x64xf32> to vector<4x64xf32>
    %7 = arith.addf %4, %6 : vector<4x64xf32>
    %c3 = arith.constant 3 : index
    %c0_9 = arith.constant 0 : index
    %c0_10 = arith.constant 0 : index
    %c0_11 = arith.constant 0 : index
    %8 = vector.load %arg2[%c3, %c0_9, %c0_10, %c0_11] : memref<4x1x4x64xf32, #tpu.memory_space<vmem>>, vector<1x1x4x64xf32>
    %9 = vector.shape_cast %8 : vector<1x1x4x64xf32> to vector<4x64xf32>
    %10 = arith.addf %7, %9 : vector<4x64xf32>
    %c0_12 = arith.constant 0 : index
    %c0_13 = arith.constant 0 : index
    %11 = vector.load %arg3[%c0_12, %c0_13] : memref<8x4xf32, #tpu.memory_space<vmem>>, vector<8x4xf32>
    %cst = arith.constant dense<0.000000e+00> : vector<8x64xf32>
    %12 = tpu.matmul %11, %10, %cst {dimension_numbers = #tpu.dot_dimension_numbers<[1], [0], [0], [1], [0, 0, 1, 1], [], []>} : vector<8x4xf32>, vector<4x64xf32>, vector<8x64xf32> -> vector<8x64xf32>
    %c0_14 = arith.constant 0 : index
    %c0_15 = arith.constant 0 : index
    %13 = vector.load %arg4[%c0_14, %c0_15] : memref<8x1xf32, #tpu.memory_space<vmem>>, vector<8x1xf32>
    %14 = vector.broadcast %13 : vector<8x1xf32> to vector<8x64xf32>
    %15 = arith.mulf %12, %14 : vector<8x64xf32>
    %c0_16 = arith.constant 0 : index
    %c0_17 = arith.constant 0 : index
    %16 = vector.load %arg5[%c0_16, %c0_17] : memref<8x1xf32, #tpu.memory_space<vmem>>, vector<8x1xf32>
    %17 = vector.broadcast %16 : vector<8x1xf32> to vector<8x64xf32>
    %18 = arith.addf %15, %17 : vector<8x64xf32>
    %c0_18 = arith.constant 0 : index
    %c0_19 = arith.constant 0 : index
    %c0_20 = arith.constant 0 : index
    %19 = vector.load %arg6[%c0_18, %c0_19, %c0_20] : memref<1x8x64xf32, #tpu.memory_space<vmem>>, vector<1x8x64xf32>
    %20 = vector.shape_cast %19 : vector<1x8x64xf32> to vector<8x64xf32>
    %21 = vector.shape_cast %18 : vector<8x64xf32> to vector<1x8x64xf32>
    tpu.vector_store %arg6[%c0_18, %c0_19, %c0_20], %21 {strides = array<i32>} : memref<1x8x64xf32, #tpu.memory_space<vmem>>, vector<1x8x64xf32>,
    return
  }
  func.func @transform_0(%arg0: i32, %arg1: i32) -> (i32, i32, i32, i32) {
    %c0_i32 = arith.constant 0 : i32
    %c0_i32_0 = arith.constant 0 : i32
    %c0_i32_1 = arith.constant 0 : i32
    return %c0_i32, %arg0, %c0_i32_0, %arg1 : i32, i32, i32, i32
  }
  func.func @transform_1(%arg0: i32, %arg1: i32) -> (i32, i32) {
    %c0_i32 = arith.constant 0 : i32
    %c0_i32_0 = arith.constant 0 : i32
    %c0_i32_1 = arith.constant 0 : i32
    return %c0_i32, %c0_i32_0 : i32, i32
  }
  func.func @transform_2(%arg0: i32, %arg1: i32) -> (i32, i32) {
    %c0_i32 = arith.constant 0 : i32
    %c0_i32_0 = arith.constant 0 : i32
    %c0_i32_1 = arith.constant 0 : i32
    return %c0_i32, %c0_i32_0 : i32, i32
  }
  func.func @transform_3(%arg0: i32, %arg1: i32) -> (i32, i32) {
    %c0_i32 = arith.constant 0 : i32
    %c0_i32_0 = arith.constant 0 : i32
    %c0_i32_1 = arith.constant 0 : i32
    return %c0_i32, %c0_i32_0 : i32, i32
  }
  func.func @transform_4(%arg0: i32, %arg1: i32) -> (i32, i32, i32) {
    %c0_i32 = arith.constant 0 : i32
    %c0_i32_0 = arith.constant 0 : i32
    return %arg0, %c0_i32, %arg1 : i32, i32, i32
  }
}

</mosaic_0001>

<bundles_post_ra>
// kernel: tpu_custom_call.1
= control target key start
LH: loop header
LB: loop body
LE: loop exit
PB: predicated region body
PF: predicated region fallthrough
CT: control target
= control target key end

     0   :  { %9 = vsyncpa [#allocation3], 0  ;;  %s809_s0 = inlined_call_operand.hbm [shape: f32[4,2,4,64], index: 0, kind: input, shape index: {}]   ;;  %s810_s1 = inlined_call_operand.vmem [shape: f32[8,4], index: 1, kind: input, shape index: {}]   ;;  %s811_s2 = inlined_call_operand.vmem [shape: f32[8,1], index: 2, kind: input, shape index: {}]   ;;  %s812_s3 = inlined_call_operand.vmem [shape: f32[8,1], index: 3, kind: input, shape index: {}]   ;;  %s813_s4 = inlined_call_operand.hbm [shape: f32[2,8,64], index: 4, kind: output, shape index: {}]  }
   0x1   :  { %11 = vsyncpa [#allocation3 + $0x1], 0 }
   0x2   :  { %12 = vsyncpa [#allocation4], 0 }
   0x3   :  { %14 = vsyncpa [#allocation4 + $0x1], 0  ;;  %s669_s15 = smov 0   ;;  %s671_s16 = smov 0  }
   0x4   :  { %s673_s17 = smov 0   ;;  %s675_s18 = smov 0  }
   0x5   :  { %s677_s19 = smov 0   ;;  %s679_s20 = smov 0  }
   0x6 LB: > { %s432_s21 = sadd.s32 4294967295, %s634_s20   ;;  %s433_s22 = sadd.s32 4294967294, %s634_s20   ;;  %s634_s20 = sphi %s679_s20, %s20_s20   ;;  %s630_s19 = sphi %s677_s19, %s824_s19   ;;  %s626_s18 = sphi %s675_s18, %s823_s18   ;;  %s622_s17 = sphi %s673_s17, %s822_s17   ;;  %s618_s16 = sphi %s671_s16, %s821_s16   ;;  %s614_s15 = sphi %s669_s15, %s820_s15  }
   0x7   : > { %s32_s23 = sadd.s32 1, %s630_s19  ;;  %s41_s24 = sadd.s32 1, %s622_s17 }
   0x8   : > { %p34_p0 = scmp.ge.s32.totalorder %s32_s23, 2  ;;  %p48_p1 = scmp.ne.s32.totalorder %s622_s17, %s618_s16 }
   0x9   : > { %p49_p2 = scmp.eq.s32.totalorder %s634_s20, 0  ;;  %p54_p3 = scmp.ne.s32.totalorder %s618_s16, %s614_s15 }
   0xa   : > { %s826_s23 = smov (%p34_p0, %s32_s23), 0  ;;  %p55_p5 = scmp.eq.s32.totalorder %s432_s21, 0 }
   0xb   : > { %p710_p4 = por %p49_p2, %p48_p1  ;;  %s36_s26 = ssub.s32 %s630_s19, %s826_s23 }
   0xc   : > { %p143_p6 = scmp.eq.s32.totalorder %s432_s21, 1  ;;  %p39_p7 = scmp.eq.s32.totalorder %s36_s26, 0 }
   0xd   : > { %p716_p8 = por %p55_p5, %p54_p3  ;;  %p149_p10 = scmp.eq.s32.totalorder %s433_s22, 1 }
   0xe   : > { %p720_p9 = por %p143_p6, %p48_p1  ;;  %p469_p13 = scmp.lt.s32.totalorder %s634_s20, 2 }
   0xf   : > { %s725_s29 = scalar_select %p39_p7, %s622_s17, %s41_s24  }
  0x10   : > { %p727_p11 = por %p149_p10, %p54_p3  ;;  %s178_s5 = sand.u32 1, %s622_s17  }
  0x11   : > { %s436_s6 = sshll.u32 %s178_s5, 4  ;;  %s437_s7 = sshll.u32 %s630_s19, 6 }
  0x12   : > { %s188_s10 = scalar_lea.hbm %s809_s0, %s437_s7  ;;  %s182_s11 = scalar_lea.vmem [#allocation2], %s436_s6 }
  0x13   : > { %s189_s12 = sshll.u32 %s182_s11, 4  ;;  %p740_p0 = pnand %p469_p13, %p710_p4  ;;  %s190_s12 = int_to_ptr.vmem [resolvable:$true] %s189_s12 }
  0x14   : > { %s179_s14 = scalar_lea.sflag [#allocation3], %s178_s5  ;;  %s539_s21 = scalar_lea.vmem %s190_s12, 256 }
  0x15   : > { %p528_p1 = pneg %p740_p0  ;;  %p540_p2 = scmp.ne.s32.totalorder %s190_s12, %s539_s21 }
  0x16   : > { %s636_s22 = smov [#allocation2]  }
  0x17   : > { %p542_p3 = pnand %p540_p2, %p528_p1  ;;  %s544_s24 = sshll.u32 %s636_s22, 4  ;;  %s545_s24 = int_to_ptr.vmem [resolvable:$false] %s544_s24 }
  0x18   : > { %s546_s26 = scalar_lea.vmem %s545_s24, 512  ;;  %p547_p6 = scmp.lt.s32.totalorder %s190_s12, %s545_s24 }
  0x19   : > { %p543_p5 = pneg %p542_p3  ;;  %p548_p7 = scmp.lt.s32.totalorder %s546_s26, %s539_s21 }
  0x1b   : > { %p549_p10 = por %p548_p7, %p547_p6 }
  0x1d   : > { %p550_p12 = pnand %p549_p10, %p543_p5 }
  0x1f   : > { %553 = shalt.err (!%p550_p12)
}
  0x20   : > { %s637_s25 = smov 128   ;;  %s638_s5 = smov 64  }
  0x21   : > { %s639_s6 = smov 4   ;;  %p438_p4 = scmp.ge.s32.totalorder %s634_s20, 1 }
  0x22   : > { %464 = dma.hbm_to_vmem [thread:$0]  (!%p740_p0), %s188_s10, 256, %s190_s12, %s179_s14, %s637_s25, %s638_s5, %s639_s6  }
  0x23   : > { %p197_p13 = scmp.lt.s32.totalorder %s634_s20, 3 }
  0x25   : > { %p198_p1 = pnand %p438_p4, %p197_p13 }
  0x26   : > { %s751_s7 = sand.u32 (!%p198_p1), 1, %s618_s16  }
  0x27   : > { %201 = sbr.rel (%p198_p1) target bundleno = 264 (0x108), region = 36  ;;  %s439_s8 = sshll.u32 (!%p198_p1), %s751_s7, 4 }
  0x28   : > { %s204_s9 = scalar_lea.sflag (!%p198_p1), [#allocation3], %s751_s7  ;;  %s207_s11 = scalar_lea.vmem (!%p198_p1), [#allocation2], %s439_s8 }
  0x2c   : > { %605 = dma.done.wait (%p716_p8), %s204_s9, 256  }
  0x2d   : > { %607 = vsyncadd (%p716_p8), %s204_s9, 4294967040  ;;  %v640_v0 = vmov 0.0   ;;  %vm641_vm0 = vmmov 0   ;;  %v642_v1 = vmov 0   ;;  %v232_v2 = vld [vmem:[%s207_s11] sm:$0xf] }
  0x2e   : > { %452 = vmatprep.subr.mxu0 %v640_v0  ;;  %454 = vmatprep.mubr.msk.f32.mxu0 %vm641_vm0, %v640_v0  ;;  %v441_v3 = vld [vmem:[%s207_s11 + $0x4] sm:$0xf]  ;;  %v442_v4 = vld [vmem:[%s207_s11 + $0x8] sm:$0xf]  ;;  %v443_v7 = vld [vmem:[%s207_s11 + $0xc] sm:$0xf] }
  0x2f   : > { %525 = vset.pattern.permute.xlu0 %v642_v1  ;;  %v235_v5 = vadd.f32 %v441_v3, %v232_v2  ;;  %v321_v6 = vld [vmem:[%s811_s2] sm:$0xff]  ;;  %vm247_vm1 = vcmask 1043456   ;;  %vm243_vm2 = vcmask 31744   ;;  %s440_s22 = sshll.u32 %s751_s7, 3  ;;  %s447_s24 = sshll.u32 %s626_s18, 7  ;;  %vm335_vm3 = vcmask 523264  }
  0x30   : > { %324 = vperm.xlu0 %525, %v321_v6   ;;  %v328_v9 = vld [vmem:[%s812_s3] sm:$0xff]  ;;  %s231_s26 = scalar_lea.vmem [#allocation5], %s440_s22  ;;  %s350_s8 = scalar_lea.hbm %s813_s4, %s447_s24 }
  0x31   : > { %v238_v8 = vadd.f32 %v442_v4, %v235_v5  ;;  %v242_v11 = vld [vmem:[%s810_s1] sm:$0xff]  ;;  %s352_s25 = sshll.u32 %s231_s26, 4  ;;  %s338_s9 = scalar_lea.sflag [#allocation4], %s751_s7  ;;  %s353_s25 = int_to_ptr.vmem [resolvable:$true] %s352_s25 }
  0x32   : > { %s554_s11 = scalar_lea.vmem %s353_s25, 128  ;;  %s643_s18 = smov [#allocation5]  }
  0x33   : > { %v241_v10 = vadd.f32 %v443_v7, %v238_v8  ;;  %p555_p8 = scmp.ne.s32.totalorder %s353_s25, %s554_s11  ;;  %s558_s10 = sshll.u32 %s643_s18, 4  ;;  %s559_s10 = int_to_ptr.vmem [resolvable:$false] %s558_s10 }
  0x34   : > { %331 = vperm.xlu0 %525, %v328_v9   ;;  %s560_s12 = scalar_lea.vmem %s559_s10, 256  ;;  %p561_p2 = scmp.lt.s32.totalorder %s353_s25, %s559_s10 }
  0x35   : > { %453 = vmatpush3.msk.msra.mxu0 %vm247_vm1, %v241_v10  ;;  %p556_p12 = pnand %p555_p8, %p720_p9  ;;  %p562_p3 = scmp.lt.s32.totalorder %s560_s12, %s554_s11 }
  0x36   : > { %455 = vmatmul.mubr.msk.f32.vlgmr.msra.gmra.mxu0 %vm243_vm2, %v242_v11 }
  0x37   : > { %p557_p0 = pneg %p556_p12  ;;  %p563_p5 = por %p562_p3, %p561_p2 }
  0x39   : > { %p564_p6 = pnand %p563_p5, %p557_p0 }
  0xab   : > { %v325_v12 = vpop.permute.xlu0 %324 }
  0xaf   : > { %v332_v15 = vpop.permute.xlu0 %331 }
  0xf6   : > { %v317_v13 = vpop.f32.mrf.mxu0 }
  0xf7   : > { %v327_v14 = vmul.f32 %v325_v12, %v317_v13 }
  0xf8   : > { %v456_v16 = vpop.f32.mrf.mxu0 }
  0xf9   : > { %v334_v17 = vadd.f32 %v332_v15, %v327_v14 }
  0xfb   : > { %336 = vst.msk [vmem:[%s231_s26] sm:$0xff] %vm335_vm3, %v334_v17 }
  0xfc   : > { %567 = shalt.err (!%p564_p6)
}
  0xfd   : > { %s568_s27 = scalar_lea.hbm %s350_s8, 128  ;;  %s572_s14 = scalar_lea.hbm %s813_s4, 256 }
  0xfe   : > { %p569_p7 = scmp.ne.s32.totalorder %s350_s8, %s568_s27  ;;  %p573_p13 = scmp.lt.s32.totalorder %s350_s8, %s813_s4 }
  0xff   : > { %p574_p1 = scmp.lt.s32.totalorder %s572_s14, %s568_s27 }
 0x100   : > { %p570_p10 = pnand %p569_p7, %p720_p9 }
 0x101   : > { %p575_p8 = por %p574_p1, %p573_p13 }
 0x102   : > { %p571_p4 = pneg %p570_p10 }
 0x104   : > { %p576_p12 = pnand %p575_p8, %p571_p4 }
 0x106   : > { %579 = shalt.err (!%p576_p12)
}
 0x107   : > { %459 = dma.vmem_to_hbm [thread:$0]  (%p720_p9), %s353_s25, 128, %s350_s8, %s338_s9  }
 0x108 PF: > { %s364_s24 = sand.u32 1, %s614_s15   ;;  %p819_p0 = scmp.ge.s32.totalorder %s634_s20, 2 }
 0x109   : > { %s365_s26 = scalar_lea.sflag [#allocation4], %s364_s24 }
 0x10a   : > { %p466_p2 = pnand %p819_p0, %p727_p11 }
 0x10c   : > { %p467_p3 = pneg %p466_p2 }
 0x10e   : > { %609 = dma.done.wait (%p467_p3), %s365_s26, 128  }
 0x10f   : > { %611 = vsyncadd (%p467_p3), %s365_s26, 4294967168  ;;  %s20_s20 = sadd.s32 1, %s634_s20   ;;  %s820_s15 = smov %s618_s16 }
 0x110   : > { %p17_p5 = scmp.ge.s32.totalorder %s20_s20, 4   ;;  %s821_s16 = smov %s622_s17 }
 0x111   : > { %s822_s17 = smov %s725_s29  ;;  %s823_s18 = smov %s630_s19 }
 0x112   : > { %s824_s19 = smov %s826_s23  ;;  %19 = sbr.rel (!%p17_p5) target bundleno = 6 (0x6), region = 84 }
 0x117   :  { %370 = vsyncpa [#allocation3], 1 }
 0x118   :  { %372 = vsyncpa [#allocation3 + $0x1], 1 }
 0x119   :  { %373 = vsyncpa [#allocation4], 1 }
 0x11a   :  { %375 = vsyncpa [#allocation4 + $0x1], 1 }

</bundles_post_ra>
